<compile_context>
chip_gen: v7x
topology: tpu7x:2x2x1
jax: 0.10.0
libtpu: 0.0.40
codegen_flags: <defaults>
</compile_context>

<pallas_src>
import functools

import jax
import jax.numpy as jnp
from jax.experimental import pallas as pl
from jax.experimental.pallas import tpu as pltpu


def lstm_chunk_kernel(xp_ref, whh_ref, wlin_ref, blin_ref, out_ref,
                      h_scr, c_scr, *, hidden_size, seq_len, t_block):
    """One (Tb, Bb, 4H) chunk of the LSTM recurrence.

    xp_ref  : (Tb, Bb, 4H) bf16  precomputed x@W_ih^T + (b_ih + b_hh), time-major
    whh_ref : (H, 4H)      bf16  hidden->gates weights (transposed), resident
    wlin_ref: (H, Op)      bf16  final linear weight (transposed, O padded)
    blin_ref: (1, Op)      f32   final linear bias (padded)
    out_ref : (Bb, Op)     f32   Linear(last hidden)
    h_scr/c_scr : (Bb, H)  f32   hidden / cell state carried across time blocks
    """
    H = hidden_size
    tb = pl.program_id(1)
    last_tb = pl.num_programs(1) - 1

    @pl.when(tb == 0)
    def _init():
        h_scr[...] = jnp.zeros_like(h_scr)
        c_scr[...] = jnp.zeros_like(c_scr)

    whh = whh_ref[...]                                   # (H, 4H) bf16, resident

    needs_mask = (seq_len % t_block) != 0                # static

    def step(t_local, carry):
        h, c = carry
        # gates = input_proj[t] + h @ W_hh^T   (bf16 MXU operands, f32 accumulate)
        gates = xp_ref[t_local].astype(jnp.float32) + jnp.dot(
            h.astype(jnp.bfloat16), whh, preferred_element_type=jnp.float32)
        # PyTorch LSTM gate ordering: i, f, g, o  (lane-aligned slices for H%128==0)
        i_g = jax.nn.sigmoid(gates[:, 0 * H:1 * H])
        f_g = jax.nn.sigmoid(gates[:, 1 * H:2 * H])
        g_g = jnp.tanh(gates[:, 2 * H:3 * H])
        o_g = jax.nn.sigmoid(gates[:, 3 * H:4 * H])
        c_new = f_g * c + i_g * g_g
        h_new = o_g * jnp.tanh(c_new)
        if needs_mask:                                   # only traced if T % Tb != 0
            valid = (tb * t_block + t_local) < seq_len
            h_new = jnp.where(valid, h_new, h)
            c_new = jnp.where(valid, c_new, c)
        return h_new, c_new

    h, c = jax.lax.fori_loop(0, t_block, step, (h_scr[...], c_scr[...]),
                             unroll=max(1, min(4, t_block)))
    h_scr[...] = h
    c_scr[...] = c

    @pl.when(tb == last_tb)
    def _finalize():
        out_ref[...] = (jnp.dot(h.astype(jnp.bfloat16), wlin_ref[...],
                                preferred_element_type=jnp.float32)
                        + blin_ref[...]).astype(out_ref.dtype)


def rnn_forward(inputs, embed_table, w_ih, w_hh, b_ih, b_hh, w_lin, b_lin,
                *, t_block=None, batch_block=None):
    """inputs: int32 (B, T).  Returns (B, output_size) float32."""
    B, T = inputs.shape
    E = embed_table.shape[1]
    H = w_hh.shape[1]
    O = w_lin.shape[0]

    # ---- padding --------------------------------------------------------
    # Batch padded to a multiple of 16 (bf16 sublane packing of xproj).  For
    # real workloads grow Bp toward 128/256 (MXU rows) instead of running
    # multiple tiny-Bp kernels; padded rows (token 1 -> zero embedding) are
    # sliced off at the end.
    Bp = max(16, -(-B // 16) * 16)
    inputs_p = jnp.pad(inputs, ((0, Bp - B), (0, 0)), constant_values=1)

    # Output lane-dense: pad O to a multiple of 128 so the final store is a
    # full-width vst, not a masked partial store.
    Op = max(128, -(-O // 128) * 128)

    # ---- hoisted embedding gather + input projection (plain XLA) ---------
    xe = embed_table[inputs_p.T]                                   # (T, Bp, E) time-major
    bias = (b_ih + b_hh).astype(jnp.float32)                       # (4H,)
    xproj = jnp.dot(xe.reshape(T * Bp, E).astype(jnp.bfloat16),
                    w_ih.T.astype(jnp.bfloat16),
                    preferred_element_type=jnp.float32)
    xproj = (xproj + bias).reshape(T, Bp, 4 * H)
    xproj = xproj.astype(jnp.bfloat16)                             # streamed from HBM in bf16

    # ---- time blocking (~8 MiB per chunk so double-buffering fits v7x) ---
    bytes_per_step = Bp * 4 * H * 2                                # bf16
    if t_block is None:
        t_block = max(1, min(T, (8 << 20) // bytes_per_step))
    Tb = int(t_block)
    n_tb = -(-T // Tb)
    Tp = n_tb * Tb
    if Tp > T:
        xproj = jnp.pad(xproj, ((0, Tp - T), (0, 0), (0, 0)))      # masked in-kernel

    # ---- batch blocking (v7x: set batch_block = Bp // 2 to use both TCs) --
    if batch_block is None:
        batch_block = Bp
    Bb = int(batch_block)
    assert Bp % Bb == 0 and Bb % 8 == 0
    n_bb = Bp // Bb

    # ---- resident weights -------------------------------------------------
    whh_t = w_hh.T.astype(jnp.bfloat16)                            # (H, 4H)
    wlin_t = jnp.zeros((H, Op), jnp.bfloat16).at[:, :O].set(
        w_lin.T.astype(jnp.bfloat16))                              # (H, Op)
    blin = jnp.zeros((1, Op), jnp.float32).at[0, :O].set(
        b_lin.astype(jnp.float32))                                 # (1, Op)

    # ---- explicit VMEM budget (double-buffered chunks + resident weights) --
    chunk_bytes = Tb * Bb * 4 * H * 2
    weight_bytes = (4 * H * H + H * Op) * 2 + Op * 4
    vmem_limit = int(min(64 << 20,
                         max(32 << 20, 4 * chunk_bytes + weight_bytes + (8 << 20))))

    kernel = functools.partial(lstm_chunk_kernel, hidden_size=H, seq_len=T,
                               t_block=Tb)

    out_p = pl.pallas_call(
        kernel,
        out_shape=jax.ShapeDtypeStruct((Bp, Op), jnp.float32),
        grid_spec=pltpu.PrefetchScalarGridSpec(
            num_scalar_prefetch=0,
            grid=(n_bb, n_tb),
            in_specs=[
                # streamed, double-buffered time chunks
                pl.BlockSpec((Tb, Bb, 4 * H), lambda b, t: (t, b, 0)),
                # resident weights (constant block index -> DMA'd once)
                pl.BlockSpec((H, 4 * H), lambda b, t: (0, 0)),
                pl.BlockSpec((H, Op), lambda b, t: (0, 0)),
                pl.BlockSpec((1, Op), lambda b, t: (0, 0)),
            ],
            out_specs=pl.BlockSpec((Bb, Op), lambda b, t: (b, 0)),
            scratch_shapes=[pltpu.VMEM((Bb, H), jnp.float32),      # h
                            pltpu.VMEM((Bb, H), jnp.float32)],     # c
        ),
        compiler_params=pltpu.CompilerParams(
            dimension_semantics=("parallel", "arbitrary"),
            vmem_limit_bytes=vmem_limit),
    )(xproj, whh_t, wlin_t, blin)

    return out_p[:B, :O]


def _reference_forward(inputs, embed_table, w_ih, w_hh, b_ih, b_hh, w_lin, b_lin):
    """Pure-JAX f32 reference matching torch.nn.LSTM semantics (sanity check)."""
    B, T = inputs.shape
    H = w_hh.shape[1]
    x = embed_table[inputs]                     # (B, T, E)
    h = jnp.zeros((B, H), jnp.float32)
    c = jnp.zeros((B, H), jnp.float32)
    for t in range(T):
        gates = x[:, t] @ w_ih.T + b_ih + h @ w_hh.T + b_hh
        i = jax.nn.sigmoid(gates[:, 0 * H:1 * H])
        f = jax.nn.sigmoid(gates[:, 1 * H:2 * H])
        g = jnp.tanh(gates[:, 2 * H:3 * H])
        o = jax.nn.sigmoid(gates[:, 3 * H:4 * H])
        c = f * c + i * g
        h = o * jnp.tanh(c)
    return h @ w_lin.T + b_lin


if __name__ == "__main__":
    # Module hyper-parameters (small, lane-aligned hidden size).
    input_size = 16      # vocab size
    embed_size = 32
    hidden_size = 128    # multiple of 128 -> gate slices are lane-dense
    output_size = 8
    B, T = 2, 8

    key = jax.random.PRNGKey(0)
    k_in, k_emb, k_ih, k_hh, k_bih, k_bhh, k_wl, k_bl = jax.random.split(key, 8)

    # Deterministic synthetic parameters.
    embed_table = 0.1 * jax.random.normal(k_emb, (input_size, embed_size), jnp.float32)
    embed_table = embed_table.at[1].set(0.0)   # padding_idx=1 -> zero embedding
    w_ih = 0.1 * jax.random.normal(k_ih, (4 * hidden_size, embed_size), jnp.float32)
    w_hh = 0.1 * jax.random.normal(k_hh, (4 * hidden_size, hidden_size), jnp.float32)
    b_ih = 0.1 * jax.random.normal(k_bih, (4 * hidden_size,), jnp.float32)
    b_hh = 0.1 * jax.random.normal(k_bhh, (4 * hidden_size,), jnp.float32)
    w_lin = 0.1 * jax.random.normal(k_wl, (output_size, hidden_size), jnp.float32)
    b_lin = 0.1 * jax.random.normal(k_bl, (output_size,), jnp.float32)

    # Integer token inputs (B, T), include a padding token (index 1).
    inputs = jax.random.randint(k_in, (B, T), 0, input_size, dtype=jnp.int32)
    inputs = inputs.at[0, -1].set(1)

    # t_block=2 so the toy run actually exercises the time-blocked pipeline and
    # the h/c scratch carry across grid steps (production default picks ~8 MiB chunks).
    out = rnn_forward(inputs, embed_table, w_ih, w_hh, b_ih, b_hh, w_lin, b_lin,
                      t_block=2)
    out = jax.block_until_ready(out)

    ref = _reference_forward(inputs, embed_table, w_ih, w_hh, b_ih, b_hh, w_lin, b_lin)
    assert out.shape == (B, output_size)
    # bf16 activation storage + bf16 MXU operands => relaxed tolerance (per review).
    assert jnp.allclose(out, ref, atol=2e-2, rtol=2e-2), (out, ref)

    print("KERNEL_OK")
</pallas_src>

<mosaic_0001>
module attributes {stable_mosaic.version = 11 : i64} {
  func.func @lstm_chunk_kernel(%arg0: i32, %arg1: i32, %arg2: memref<2x16x512xbf16, #tpu.memory_space<vmem>>, %arg3: memref<128x512xbf16, #tpu.memory_space<vmem>>, %arg4: memref<128x128xbf16, #tpu.memory_space<vmem>>, %arg5: memref<1x128xf32, #tpu.memory_space<vmem>>, %arg6: memref<16x128xf32, #tpu.memory_space<vmem>>, %arg7: memref<16x128xf32, #tpu.memory_space<vmem>>, %arg8: memref<16x128xf32, #tpu.memory_space<vmem>>) attributes {dimension_semantics = [#tpu.dimension_semantics<parallel>, #tpu.dimension_semantics<arbitrary>], iteration_bounds = array<i64: 1, 4>, scalar_prefetch = 0 : i64, scratch_operands = 2 : i64, tpu.core_type = #tpu.core_type<tc>, window_params = [{transform_indices = @transform_0, window_bounds = array<i64: 2, 16, 512>}, {pipeline_mode = #tpu.pipeline_mode<synchronous>, transform_indices = @transform_1, window_bounds = array<i64: 128, 512>}, {pipeline_mode = #tpu.pipeline_mode<synchronous>, transform_indices = @transform_2, window_bounds = array<i64: 128, 128>}, {pipeline_mode = #tpu.pipeline_mode<synchronous>, transform_indices = @transform_3, window_bounds = array<i64: 1, 128>}, {transform_indices = @transform_4, window_bounds = array<i64: 16, 128>}]} {
    %c0_i32 = arith.constant 0 : i32
    %0 = arith.cmpi eq, %arg1, %c0_i32 : i32
    %1 = arith.extui %0 : i1 to i32
    %c0_i32_0 = arith.constant 0 : i32
    %2 = arith.cmpi ne, %1, %c0_i32_0 : i32
    scf.if %2 {
      %cst_23 = arith.constant 0.000000e+00 : f32
      %75 = vector.broadcast %cst_23 : f32 to vector<16x128xf32>
      %c0_24 = arith.constant 0 : index
      %c0_25 = arith.constant 0 : index
      %76 = vector.load %arg7[%c0_24, %c0_25] : memref<16x128xf32, #tpu.memory_space<vmem>>, vector<16x128xf32>
      tpu.vector_store %arg7[%c0_24, %c0_25], %75 {strides = array<i32>} : memref<16x128xf32, #tpu.memory_space<vmem>>, vector<16x128xf32>,
      %cst_26 = arith.constant 0.000000e+00 : f32
      %77 = vector.broadcast %cst_26 : f32 to vector<16x128xf32>
      %c0_27 = arith.constant 0 : index
      %c0_28 = arith.constant 0 : index
      %78 = vector.load %arg8[%c0_27, %c0_28] : memref<16x128xf32, #tpu.memory_space<vmem>>, vector<16x128xf32>
      tpu.vector_store %arg8[%c0_27, %c0_28], %77 {strides = array<i32>} : memref<16x128xf32, #tpu.memory_space<vmem>>, vector<16x128xf32>,
    } else {
    }
    %c0 = arith.constant 0 : index
    %c0_1 = arith.constant 0 : index
    %3 = vector.load %arg3[%c0, %c0_1] : memref<128x512xbf16, #tpu.memory_space<vmem>>, vector<128x512xbf16>
    %c0_2 = arith.constant 0 : index
    %c0_3 = arith.constant 0 : index
    %4 = vector.load %arg7[%c0_2, %c0_3] : memref<16x128xf32, #tpu.memory_space<vmem>>, vector<16x128xf32>
    %c0_4 = arith.constant 0 : index
    %c0_5 = arith.constant 0 : index
    %5 = vector.load %arg8[%c0_4, %c0_5] : memref<16x128xf32, #tpu.memory_space<vmem>>, vector<16x128xf32>
    %c0_i32_6 = arith.constant 0 : i32
    %6 = arith.index_cast %c0_i32_6 : i32 to index
    %c0_7 = arith.constant 0 : index
    %c0_8 = arith.constant 0 : index
    %7 = vector.load %arg2[%6, %c0_7, %c0_8] : memref<2x16x512xbf16, #tpu.memory_space<vmem>>, vector<1x16x512xbf16>
    %8 = vector.shape_cast %7 : vector<1x16x512xbf16> to vector<16x512xbf16>
    %9 = arith.extf %8 : vector<16x512xbf16> to vector<16x512xf32>
    %10 = arith.truncf %4 : vector<16x128xf32> to vector<16x128xbf16>
    %cst = arith.constant dense<0.000000e+00> : vector<16x512xf32>
    %11 = tpu.matmul %10, %3, %cst {dimension_numbers = #tpu.dot_dimension_numbers<[1], [0], [0], [1], [0, 0, 1, 1], [], []>} : vector<16x128xbf16>, vector<128x512xbf16>, vector<16x512xf32> -> vector<16x512xf32>
    %12 = arith.addf %9, %11 : vector<16x512xf32>
    %13 = vector.extract_strided_slice %12 {offsets = [0, 0], sizes = [16, 128], strides = [1, 1]} : vector<16x512xf32> to vector<16x128xf32>
    %14 = arith.negf %13 : vector<16x128xf32>
    %15 = math.exp %14 : vector<16x128xf32>
    %cst_9 = arith.constant 1.000000e+00 : f32
    %16 = vector.broadcast %cst_9 : f32 to vector<16x128xf32>
    %17 = arith.addf %16, %15 : vector<16x128xf32>
    %18 = arith.divf %16, %17 : vector<16x128xf32>
    %19 = vector.extract_strided_slice %12 {offsets = [0, 128], sizes = [16, 128], strides = [1, 1]} : vector<16x512xf32> to vector<16x128xf32>
    %20 = arith.negf %19 : vector<16x128xf32>
    %21 = math.exp %20 : vector<16x128xf32>
    %cst_10 = arith.constant 1.000000e+00 : f32
    %22 = vector.broadcast %cst_10 : f32 to vector<16x128xf32>
    %23 = arith.addf %22, %21 : vector<16x128xf32>
    %24 = arith.divf %22, %23 : vector<16x128xf32>
    %25 = vector.extract_strided_slice %12 {offsets = [0, 256], sizes = [16, 128], strides = [1, 1]} : vector<16x512xf32> to vector<16x128xf32>
    %26 = math.tanh %25 : vector<16x128xf32>
    %27 = vector.extract_strided_slice %12 {offsets = [0, 384], sizes = [16, 128], strides = [1, 1]} : vector<16x512xf32> to vector<16x128xf32>
    %28 = arith.negf %27 : vector<16x128xf32>
    %29 = math.exp %28 : vector<16x128xf32>
    %cst_11 = arith.constant 1.000000e+00 : f32
    %30 = vector.broadcast %cst_11 : f32 to vector<16x128xf32>
    %31 = arith.addf %30, %29 : vector<16x128xf32>
    %32 = arith.divf %30, %31 : vector<16x128xf32>
    %33 = arith.mulf %24, %5 : vector<16x128xf32>
    %34 = arith.mulf %18, %26 : vector<16x128xf32>
    %35 = arith.addf %33, %34 : vector<16x128xf32>
    %36 = math.tanh %35 : vector<16x128xf32>
    %37 = arith.mulf %32, %36 : vector<16x128xf32>
    %c1_i32 = arith.constant 1 : i32
    %38 = arith.index_cast %c1_i32 : i32 to index
    %c0_12 = arith.constant 0 : index
    %c0_13 = arith.constant 0 : index
    %39 = vector.load %arg2[%38, %c0_12, %c0_13] : memref<2x16x512xbf16, #tpu.memory_space<vmem>>, vector<1x16x512xbf16>
    %40 = vector.shape_cast %39 : vector<1x16x512xbf16> to vector<16x512xbf16>
    %41 = arith.extf %40 : vector<16x512xbf16> to vector<16x512xf32>
    %42 = arith.truncf %37 : vector<16x128xf32> to vector<16x128xbf16>
    %cst_14 = arith.constant dense<0.000000e+00> : vector<16x512xf32>
    %43 = tpu.matmul %42, %3, %cst_14 {dimension_numbers = #tpu.dot_dimension_numbers<[1], [0], [0], [1], [0, 0, 1, 1], [], []>} : vector<16x128xbf16>, vector<128x512xbf16>, vector<16x512xf32> -> vector<16x512xf32>
    %44 = arith.addf %41, %43 : vector<16x512xf32>
    %45 = vector.extract_strided_slice %44 {offsets = [0, 0], sizes = [16, 128], strides = [1, 1]} : vector<16x512xf32> to vector<16x128xf32>
    %46 = arith.negf %45 : vector<16x128xf32>
    %47 = math.exp %46 : vector<16x128xf32>
    %cst_15 = arith.constant 1.000000e+00 : f32
    %48 = vector.broadcast %cst_15 : f32 to vector<16x128xf32>
    %49 = arith.addf %48, %47 : vector<16x128xf32>
    %50 = arith.divf %48, %49 : vector<16x128xf32>
    %51 = vector.extract_strided_slice %44 {offsets = [0, 128], sizes = [16, 128], strides = [1, 1]} : vector<16x512xf32> to vector<16x128xf32>
    %52 = arith.negf %51 : vector<16x128xf32>
    %53 = math.exp %52 : vector<16x128xf32>
    %cst_16 = arith.constant 1.000000e+00 : f32
    %54 = vector.broadcast %cst_16 : f32 to vector<16x128xf32>
    %55 = arith.addf %54, %53 : vector<16x128xf32>
    %56 = arith.divf %54, %55 : vector<16x128xf32>
    %57 = vector.extract_strided_slice %44 {offsets = [0, 256], sizes = [16, 128], strides = [1, 1]} : vector<16x512xf32> to vector<16x128xf32>
    %58 = math.tanh %57 : vector<16x128xf32>
    %59 = vector.extract_strided_slice %44 {offsets = [0, 384], sizes = [16, 128], strides = [1, 1]} : vector<16x512xf32> to vector<16x128xf32>
    %60 = arith.negf %59 : vector<16x128xf32>
    %61 = math.exp %60 : vector<16x128xf32>
    %cst_17 = arith.constant 1.000000e+00 : f32
    %62 = vector.broadcast %cst_17 : f32 to vector<16x128xf32>
    %63 = arith.addf %62, %61 : vector<16x128xf32>
    %64 = arith.divf %62, %63 : vector<16x128xf32>
    %65 = arith.mulf %56, %35 : vector<16x128xf32>
    %66 = arith.mulf %50, %58 : vector<16x128xf32>
    %67 = arith.addf %65, %66 : vector<16x128xf32>
    %68 = math.tanh %67 : vector<16x128xf32>
    %69 = arith.mulf %64, %68 : vector<16x128xf32>
    %c2_i32 = arith.constant 2 : i32
    %c0_18 = arith.constant 0 : index
    %c0_19 = arith.constant 0 : index
    %70 = vector.load %arg7[%c0_18, %c0_19] : memref<16x128xf32, #tpu.memory_space<vmem>>, vector<16x128xf32>
    tpu.vector_store %arg7[%c0_18, %c0_19], %69 {strides = array<i32>} : memref<16x128xf32, #tpu.memory_space<vmem>>, vector<16x128xf32>,
    %c0_20 = arith.constant 0 : index
    %c0_21 = arith.constant 0 : index
    %71 = vector.load %arg8[%c0_20, %c0_21] : memref<16x128xf32, #tpu.memory_space<vmem>>, vector<16x128xf32>
    tpu.vector_store %arg8[%c0_20, %c0_21], %67 {strides = array<i32>} : memref<16x128xf32, #tpu.memory_space<vmem>>, vector<16x128xf32>,
    %c3_i32 = arith.constant 3 : i32
    %72 = arith.cmpi eq, %arg1, %c3_i32 : i32
    %73 = arith.extui %72 : i1 to i32
    %c0_i32_22 = arith.constant 0 : i32
    %74 = arith.cmpi ne, %73, %c0_i32_22 : i32
    scf.if %74 {
      %75 = arith.truncf %69 : vector<16x128xf32> to vector<16x128xbf16>
      %c0_23 = arith.constant 0 : index
      %c0_24 = arith.constant 0 : index
      %76 = vector.load %arg4[%c0_23, %c0_24] : memref<128x128xbf16, #tpu.memory_space<vmem>>, vector<128x128xbf16>
      %cst_25 = arith.constant dense<0.000000e+00> : vector<16x128xf32>
      %77 = tpu.matmul %75, %76, %cst_25 {dimension_numbers = #tpu.dot_dimension_numbers<[1], [0], [0], [1], [0, 0, 1, 1], [], []>} : vector<16x128xbf16>, vector<128x128xbf16>, vector<16x128xf32> -> vector<16x128xf32>
      %c0_26 = arith.constant 0 : index
      %c0_27 = arith.constant 0 : index
      %78 = vector.load %arg5[%c0_26, %c0_27] : memref<1x128xf32, #tpu.memory_space<vmem>>, vector<1x128xf32>
      %79 = vector.broadcast %78 : vector<1x128xf32> to vector<16x128xf32>
      %80 = arith.addf %77, %79 : vector<16x128xf32>
      %c0_28 = arith.constant 0 : index
      %c0_29 = arith.constant 0 : index
      %81 = vector.load %arg6[%c0_28, %c0_29] : memref<16x128xf32, #tpu.memory_space<vmem>>, vector<16x128xf32>
      tpu.vector_store %arg6[%c0_28, %c0_29], %80 {strides = array<i32>} : memref<16x128xf32, #tpu.memory_space<vmem>>, vector<16x128xf32>,
    } else {
    }
    return
  }
  func.func @transform_0(%arg0: i32, %arg1: i32) -> (i32, i32, i32) {
    %c0_i32 = arith.constant 0 : i32
    %c0_i32_0 = arith.constant 0 : i32
    return %arg1, %arg0, %c0_i32 : i32, i32, i32
  }
  func.func @transform_1(%arg0: i32, %arg1: i32) -> (i32, i32) {
    %c0_i32 = arith.constant 0 : i32
    %c0_i32_0 = arith.constant 0 : i32
    %c0_i32_1 = arith.constant 0 : i32
    return %c0_i32, %c0_i32_0 : i32, i32
  }
  func.func @transform_2(%arg0: i32, %arg1: i32) -> (i32, i32) {
    %c0_i32 = arith.constant 0 : i32
    %c0_i32_0 = arith.constant 0 : i32
    %c0_i32_1 = arith.constant 0 : i32
    return %c0_i32, %c0_i32_0 : i32, i32
  }
  func.func @transform_3(%arg0: i32, %arg1: i32) -> (i32, i32) {
    %c0_i32 = arith.constant 0 : i32
    %c0_i32_0 = arith.constant 0 : i32
    %c0_i32_1 = arith.constant 0 : i32
    return %c0_i32, %c0_i32_0 : i32, i32
  }
  func.func @transform_4(%arg0: i32, %arg1: i32) -> (i32, i32) {
    %c0_i32 = arith.constant 0 : i32
    %c0_i32_0 = arith.constant 0 : i32
    return %arg0, %c0_i32 : i32, i32
  }
}

</mosaic_0001>

<bundles_post_ra>
// kernel: tpu_custom_call.1
= control target key start
LH: loop header
LB: loop body
LE: loop exit
PB: predicated region body
PF: predicated region fallthrough
CT: control target
= control target key end

     0   :  { %9 = vsyncpa [#allocation5], 0  ;;  %s1815_s0 = inlined_call_operand.hbm [shape: bf16[8,16,512], index: 0, kind: input, shape index: {}]   ;;  %s1816_s1 = inlined_call_operand.hbm [shape: bf16[128,512], index: 1, kind: input, shape index: {}]   ;;  %s1817_s2 = inlined_call_operand.hbm [shape: bf16[128,128], index: 2, kind: input, shape index: {}]   ;;  %s1818_s3 = inlined_call_operand.vmem [shape: f32[1,128], index: 3, kind: input, shape index: {}]   ;;  %s1819_s4 = inlined_call_operand.hbm [shape: f32[16,128], index: 4, kind: output, shape index: {}]  }
   0x1   :  { %11 = vsyncpa [#allocation5 + $0x1], 0 }
   0x2   :  { %12 = vsyncpa [#allocation8], 0 }
   0x3   :  { %13 = vsyncpa [#allocation6], 0  ;;  %s1524_s15 = smov 0   ;;  %s1526_s16 = smov 0  }
   0x4   :  { %s1528_s17 = smov 0   ;;  %s1530_s18 = smov 0  }
   0x5   :  { %s1532_s19 = smov 0   ;;  %s1534_s20 = smov 0  }
   0x6 LB: > { %s993_s21 = sadd.s32 4294967295, %s1483_s20   ;;  %p53_p0 = scmp.ne.s32.totalorder %s1467_s16, %s1463_s15  ;;  %s1483_s20 = sphi %s1534_s20, %s19_s20   ;;  %s1479_s19 = sphi %s1532_s19, %s1838_s19   ;;  %s1475_s18 = sphi %s1530_s18, %s1837_s18   ;;  %s1471_s17 = sphi %s1528_s17, %s1836_s17   ;;  %s1467_s16 = sphi %s1526_s16, %s1835_s16   ;;  %s1463_s15 = sphi %s1524_s15, %s1834_s15  }
   0x7   : > { %p1556_p1 = scmp.eq.s32.totalorder %s993_s21, 0  ;;  %p994_p2 = scmp.ge.s32.totalorder %s1483_s20, 1 }
   0x8   : > { %p153_p3 = scmp.lt.s32.totalorder %s1483_s20, 5  ;;  %s1485_s25 = smov [#allocation7]  }
   0x9   : > { %s1824_s22 = scalar_select %p1556_p1, 1, 0 }
   0xa   : > { %p1564_p4 = por %p1556_p1, %p53_p0  ;;  %p1568_p5 = pnand %p994_p2, %p153_p3 }
   0xb   : > { %s165_s26 = sshll.u32 %s1485_s25, 4  ;;  %s1486_s28 = smov [#allocation9]   ;;  %s166_s26 = int_to_ptr.vmem [resolvable:$true] %s165_s26 }
   0xc   : > { %s1825_s23 = scalar_select %p1564_p4, 1, 0 }
   0xd   : > { %s1826_s24 = scalar_select %p1568_p5, 1, 0 }
   0xe   : > { %p1114_p6 = pneg %p1568_p5  ;;  %s178_s29 = sshll.u32 %s1486_s28, 4  ;;  %s1580_s29 = int_to_ptr.vmem [resolvable:$true] %s178_s29 }
   0xf   : > { %s1313_s6 = scalar_lea.hbm %s1816_s1, 4096 }
  0x10   : > { %p1576_p7 = pnand %p1114_p6, %p1556_p1  ;;  %p1314_p8 = scmp.ne.s32.totalorder %s1816_s1, %s1313_s6 }
  0x11   : > { %p1320_p12 = scmp.lt.u32.totalorder %s1313_s6, %s1816_s1 }
  0x12   : > { %p1315_p9 = pneg %p1576_p7 }
  0x14   : > { %p1316_p10 = pnand %p1315_p9, %p1314_p8 }
  0x16   : > { %p1317_p11 = pneg %p1316_p10 }
  0x18   : > { %p1322_p13 = pnand %p1320_p12, %p1317_p11 }
  0x1a   : > { %1325 = shalt.err (!%p1322_p13)
}
  0x1b   : > { %s1326_s11 = scalar_lea.vmem %s166_s26, 4096  ;;  %p1334_p6 = scmp.lt.s32.totalorder %s166_s26, %s166_s26 }
  0x1c   : > { %p1327_p0 = scmp.ne.s32.totalorder %s166_s26, %s1326_s11  ;;  %p1335_p1 = scmp.lt.s32.totalorder %s1326_s11, %s1326_s11 }
  0x1e   : > { %p1329_p2 = pnand %p1327_p0, %p1315_p9  ;;  %p1336_p4 = por %p1335_p1, %p1334_p6 }
  0x20   : > { %p1330_p3 = pneg %p1329_p2 }
  0x22   : > { %p1337_p5 = pnand %p1336_p4, %p1330_p3 }
  0x24   : > { %1340 = shalt.err (!%p1337_p5)
}
  0x25   : > { %s1487_s12 = smov 256   ;;  %s1488_s13 = smov 16  }
  0x26   : > { %1117 = dma.hbm_to_vmem [thread:$0]  (!%p1576_p7), %s1816_s1, 4096, %s166_s26, [#allocation8], %s1487_s12, %s1487_s12, %s1488_s13  }
  0x27   : > { %s1341_s30 = scalar_lea.hbm %s1817_s2, 1024 }
  0x28   : > { %p1342_p1 = scmp.ne.s32.totalorder %s1817_s2, %s1341_s30  ;;  %p1348_p8 = scmp.lt.u32.totalorder %s1341_s30, %s1817_s2 }
  0x2a   : > { %p1344_p4 = pnand %p1342_p1, %p1315_p9 }
  0x2c   : > { %p1345_p5 = pneg %p1344_p4 }
  0x2e   : > { %p1350_p10 = pnand %p1348_p8, %p1345_p5 }
  0x30   : > { %1353 = shalt.err (!%p1350_p10)
}
  0x31   : > { %s1354_s26 = scalar_lea.vmem %s1580_s29, 1024  ;;  %p1362_p0 = scmp.lt.s32.totalorder %s1580_s29, %s1580_s29 }
  0x32   : > { %p1355_p11 = scmp.ne.s32.totalorder %s1580_s29, %s1354_s26  ;;  %p1363_p2 = scmp.lt.s32.totalorder %s1354_s26, %s1354_s26 }
  0x34   : > { %p1357_p12 = pnand %p1355_p11, %p1315_p9  ;;  %p1364_p3 = por %p1363_p2, %p1362_p0 }
  0x36   : > { %p1358_p13 = pneg %p1357_p12 }
  0x38   : > { %p1365_p6 = pnand %p1364_p3, %p1358_p13 }
  0x3a   : > { %1368 = shalt.err (!%p1365_p6)
}
  0x3b   : > { %s1489_s9 = smov 64   ;;  %s1490_s10 = smov 4  }
  0x3c   : > { %1120 = dma.hbm_to_vmem [thread:$0]  (!%p1576_p7), %s1817_s2, 1024, %s1580_s29, [#allocation8], %s1489_s9, %s1489_s9, %s1490_s10  }
  0x3d   : > { %s28_s15 = sadd.s32 1, %s1479_s19  ;;  %s40_s25 = sadd.s32 1, %s1471_s17 }
  0x3e   : > { %p29_p9 = scmp.ge.s32.totalorder %s28_s15, 4  ;;  %p47_p1 = scmp.ne.s32.totalorder %s1471_s17, %s1467_s16 }
  0x3f   : > { %p48_p4 = scmp.eq.s32.totalorder %s1483_s20, 0  ;;  %p1127_p5 = scmp.lt.s32.totalorder %s1483_s20, 4 }
  0x40   : > { %s1840_s15 = smov (%p29_p9, %s28_s15), 0  ;;  %s195_s28 = sand.u32 1, %s1471_s17  }
  0x41   : > { %p49_p8 = por %p48_p4, %p47_p1  ;;  %s35_s30 = ssub.s32 %s1479_s19, %s1840_s15 }
  0x42   : > { %p38_p10 = scmp.eq.s32.totalorder %s35_s30, 0  ;;  %s998_s5 = sshll.u32 %s195_s28, 6 }
  0x43   : > { %s1070_s27 = sshll.u32 %s1479_s19, 10  ;;  %s199_s26 = scalar_lea.vmem [#allocation4], %s998_s5 }
  0x44   : > { %s1645_s6 = scalar_select %p38_p10, %s1471_s17, %s40_s25  }
  0x45   : > { %s1650_s8 = scalar_lea.hbm %s1815_s0, %s1070_s27  ;;  %s210_s9 = sshll.u32 %s199_s26, 4  ;;  %s1652_s9 = int_to_ptr.vmem [resolvable:$true] %s210_s9 }
  0x46   : > { %p1656_p7 = pnand %p1127_p5, %p49_p8  ;;  %s1660_s11 = scalar_lea.sflag [#allocation5], %s195_s28 }
  0x47   : > { %s1369_s14 = scalar_lea.hbm %s1650_s8, 1024  ;;  %s1374_s5 = scalar_lea.hbm %s1815_s0, 4096 }
  0x48   : > { %p1370_p11 = scmp.ne.s32.totalorder %s1650_s8, %s1369_s14  ;;  %p1371_p12 = pneg %p1656_p7 }
  0x49   : > { %p1375_p2 = scmp.lt.u32.totalorder %s1650_s8, %s1815_s0  ;;  %p1376_p3 = scmp.lt.u32.totalorder %s1374_s5, %s1369_s14 }
  0x4a   : > { %p1372_p13 = pnand %p1371_p12, %p1370_p11  ;;  %p1378_p9 = scmp.lt.u32.totalorder %s1369_s14, %s1650_s8 }
  0x4b   : > { %p1377_p6 = por %p1376_p3, %p1375_p2 }
  0x4c   : > { %p1373_p0 = pneg %p1372_p13 }
  0x4d   : > { %p1379_p1 = por %p1378_p9, %p1377_p6 }
  0x4f   : > { %p1380_p4 = pnand %p1379_p1, %p1373_p0 }
  0x51   : > { %1383 = shalt.err (!%p1380_p4)
}
  0x52   : > { %s1384_s28 = scalar_lea.vmem %s1652_s9, 1024  ;;  %s1491_s29 = smov [#allocation4]  }
  0x53   : > { %p1385_p5 = scmp.ne.s32.totalorder %s1652_s9, %s1384_s28  ;;  %s1389_s26 = sshll.u32 %s1491_s29, 4  ;;  %s1390_s26 = int_to_ptr.vmem [resolvable:$false] %s1389_s26 }
  0x54   : > { %s1391_s25 = scalar_lea.vmem %s1390_s26, 2048  ;;  %p1392_p11 = scmp.lt.s32.totalorder %s1652_s9, %s1390_s26 }
  0x55   : > { %p1387_p8 = pnand %p1385_p5, %p1371_p12  ;;  %p1393_p13 = scmp.lt.s32.totalorder %s1391_s25, %s1384_s28 }
  0x57   : > { %p1388_p10 = pneg %p1387_p8  ;;  %p1394_p2 = por %p1393_p13, %p1392_p11 }
  0x59   : > { %p1395_p3 = pnand %p1394_p2, %p1388_p10 }
  0x5b   : > { %1398 = shalt.err (!%p1395_p3)
}
  0x5c   : > { %1124 = dma.hbm_to_vmem [thread:$0]  (!%p1656_p7), %s1650_s8, 1024, %s1652_s9, %s1660_s11, %s1487_s12, %s1487_s12, %s1488_s13  }
  0x5d   : > { %p1829_p12 = scmp.ne.s32.totalorder %s1826_s24, 0 }
  0x5e   : > { %s224_s14 = sand.u32 (!%p1829_p12), 1, %s1467_s16   ;;  %p1830_p0 = scmp.ne.s32.totalorder (!%p1829_p12), %s1825_s23, 0 }
  0x5f   : > { %222 = sbr.rel (%p1829_p12) target bundleno = 926 (0x39e), region = 36  ;;  %s1003_s30 = sshll.u32 (!%p1829_p12), %s224_s14, 6 }
  0x60   : > { %s225_s5 = scalar_lea.sflag (!%p1829_p12), [#allocation5], %s224_s14  ;;  %s1694_s27 = scalar_lea.vmem (!%p1829_p12), [#allocation4], %s1003_s30 }
  0x66   : > { %1450 = dma.done.wait (%p1830_p0), %s225_s5, 1024  }
  0x67   : > { %1452 = vsyncadd (%p1830_p0), %s225_s5, 4294966272  ;;  %p1831_p6 = scmp.ne.s32.totalorder %s1824_s22, 0 }
  0x69   : > { %1454 = dma.done.wait (%p1831_p6), [#allocation8], 5120  }
  0x6a   : > { %1456 = vsyncadd (%p1831_p6), [#allocation8], 4294962176  ;;  %p1006_p7 = scmp.ne.s32.totalorder %s1475_s18, 0 }
  0x6b   : > { %v1492_v0 = vmov (!%p1006_p7), 0.0  }
  0x6c   : > { %263 = sbr.rel (%p1006_p7) target bundleno = 115 (0x73), region = 52  ;;  %264 = vst [vmem:[#allocation2] sm:$0xff] (!%p1006_p7), %v1492_v0  ;;  %265 = vst [vmem:[#allocation2 + $0x8] sm:$0xff] (!%p1006_p7), %v1492_v0 }
  0x6d   : > { %266 = vst [vmem:[#allocation3] sm:$0xff] (!%p1006_p7), %v1492_v0  ;;  %267 = vst [vmem:[#allocation3 + $0x8] sm:$0xff] (!%p1006_p7), %v1492_v0 }
  0x73 PF: > { %v1705_v1 = vld [vmem:[#allocation7 + $0x4] ss:$16 sps:$4 sm:$0xff]   ;;  %v1707_v2 = vld [vmem:[#allocation7] ss:$16 sps:$4 sm:$0xff]   ;;  %v1493_v3 = vmov 0   ;;  %v301_v32 = vld [vmem:[#allocation2 + $0x8] sm:$0xff] }
  0x74   : > { %509 = vmatprep.mubr.bf16.mxu0 %v1493_v3  ;;  %552 = vmatprep.mubr.bf16.mxu1 %v1493_v3  ;;  %v1712_v4 = vld [vmem:[#allocation7 + $0x24] ss:$16 sps:$4 sm:$0xff]   ;;  %v1715_v5 = vld [vmem:[#allocation7 + $0x20] ss:$16 sps:$4 sm:$0xff]   ;;  %v1720_v7 = vld [vmem:[#allocation7 + $0xc] ss:$16 sps:$4 sm:$0xff]  }
  0x75   : > { %477 = vmatprep.subr.bf16.mxu0 %v1705_v1  ;;  %v1718_v6 = vld [vmem:[#allocation7 + $0x44] ss:$16 sps:$4 sm:$0xff]   ;;  %v1722_v8 = vld [vmem:[#allocation7 + $0x8] ss:$16 sps:$4 sm:$0xff]   ;;  %v1725_v9 = vld [vmem:[#allocation7 + $0x40] ss:$16 sps:$4 sm:$0xff]   ;;  %520 = vmatprep.subr.bf16.mxu1 %v1720_v7 }
  0x76   : > { %478 = vmatpush1.bf16.msra.mxu0 %v1707_v2  ;;  %v1729_v10 = vld [vmem:[#allocation7 + $0x64] ss:$16 sps:$4 sm:$0xff]   ;;  %521 = vmatpush1.bf16.msra.mxu1 %v1722_v8  ;;  %v1210_v11 = vld [vmem:[#allocation7 + $0x2c] ss:$16 sps:$4 sm:$0xff]   ;;  %v1213_v12 = vld [vmem:[#allocation7 + $0x28] ss:$16 sps:$4 sm:$0xff]  }
  0x77   : > { %479 = vmatprep.subr.bf16.mxu0 %v1712_v4  ;;  %522 = vmatprep.subr.bf16.mxu1 %v1210_v11  ;;  %v1206_v13 = vld [vmem:[#allocation7 + $0x60] ss:$16 sps:$4 sm:$0xff]   ;;  %v1733_v14 = vld [vmem:[#allocation7 + $0x84] ss:$16 sps:$4 sm:$0xff]   ;;  %v1216_v15 = vld [vmem:[#allocation7 + $0x4c] ss:$16 sps:$4 sm:$0xff]  }
  0x78   : > { %v1219_v16 = vld [vmem:[#allocation7 + $0x48] ss:$16 sps:$4 sm:$0xff]   ;;  %v1222_v17 = vld [vmem:[#allocation7 + $0x6c] ss:$16 sps:$4 sm:$0xff]   ;;  %v1212_v18 = vld [vmem:[#allocation7 + $0x80] ss:$16 sps:$4 sm:$0xff]  }
  0x79   : > { %v1214_v19 = vld [vmem:[#allocation7 + $0xa4] ss:$16 sps:$4 sm:$0xff]   ;;  %v1225_v20 = vld [vmem:[#allocation7 + $0x68] ss:$16 sps:$4 sm:$0xff]   ;;  %v1228_v21 = vld [vmem:[#allocation7 + $0x8c] ss:$16 sps:$4 sm:$0xff]  }
  0x7a   : > { %480 = vmatpush1.bf16.msra.mxu0 %v1715_v5  ;;  %523 = vmatpush1.bf16.msra.mxu1 %v1213_v12  ;;  %v1218_v22 = vld [vmem:[#allocation7 + $0xa0] ss:$16 sps:$4 sm:$0xff]   ;;  %v1220_v23 = vld [vmem:[#allocation7 + $0xc4] ss:$16 sps:$4 sm:$0xff]   ;;  %v1231_v24 = vld [vmem:[#allocation7 + $0x88] ss:$16 sps:$4 sm:$0xff]  }
  0x7b   : > { %481 = vmatprep.subr.bf16.mxu0 %v1718_v6  ;;  %524 = vmatprep.subr.bf16.mxu1 %v1216_v15  ;;  %v1232_v25 = vld [vmem:[#allocation7 + $0xac] ss:$16 sps:$4 sm:$0xff]   ;;  %v1224_v26 = vld [vmem:[#allocation7 + $0xc0] ss:$16 sps:$4 sm:$0xff]   ;;  %v1226_v27 = vld [vmem:[#allocation7 + $0xe4] ss:$16 sps:$4 sm:$0xff]  }
  0x7c   : > { %v1234_v28 = vld [vmem:[#allocation7 + $0xa8] ss:$16 sps:$4 sm:$0xff]   ;;  %v1235_v29 = vld [vmem:[#allocation7 + $0xcc] ss:$16 sps:$4 sm:$0xff]   ;;  %v1230_v30 = vld [vmem:[#allocation7 + $0xe0] ss:$16 sps:$4 sm:$0xff]  }
  0x7d   : > { %v300_v31 = vld [vmem:[#allocation2] sm:$0xff]  ;;  %v1237_v33 = vld [vmem:[#allocation7 + $0xc8] ss:$16 sps:$4 sm:$0xff]   ;;  %v1238_v34 = vld [vmem:[#allocation7 + $0xec] ss:$16 sps:$4 sm:$0xff]   ;;  %p1055_p9 = scmp.ne.s32.totalorder %s1475_s18, 3 }
  0x7e   : > { %482 = vmatpush1.bf16.msra.mxu0 %v1725_v9  ;;  %525 = vmatpush1.bf16.msra.mxu1 %v1219_v16  ;;  %v316_v35 = vpack.c.bf16 %v301_v32, %v300_v31  ;;  %v1240_v36 = vld [vmem:[#allocation7 + $0xe8] ss:$16 sps:$4 sm:$0xff]   ;;  %v304_v37 = vld [vmem:[%s1694_s27] sm:$0xff]  ;;  %v306_v38 = vld [vmem:[%s1694_s27 + $0x10] sm:$0xff]  ;;  %vm1495_vm0 = vmmov (!%p1055_p9), 0  }
  0x7f   : > { %483 = vmatprep.subr.bf16.mxu0 %v1729_v10  ;;  %526 = vmatprep.subr.bf16.mxu1 %v1222_v17  ;;  %v308_v39 = vunpack.c.l.bf16 %v304_v37  ;;  %v309_v40 = vunpack.c.h.bf16 %v304_v37  ;;  %v312_v41 = vunpack.c.l.bf16 %v306_v38  ;;  %v313_v43 = vunpack.c.h.bf16 %v306_v38  ;;  %v305_v46 = vld [vmem:[%s1694_s27 + $0x8] sm:$0xff]  ;;  %v307_v49 = vld [vmem:[%s1694_s27 + $0x18] sm:$0xff] }
  0x80   : > { %v311_v55 = vunpack.c.h.bf16 %v305_v46  ;;  %v315_v58 = vunpack.c.h.bf16 %v307_v49  ;;  %v310_v60 = vunpack.c.l.bf16 %v305_v46  ;;  %v314_v62 = vunpack.c.l.bf16 %v307_v49  ;;  %v1046_v49 = vld [vmem:[%s1694_s27 + $0x28] sm:$0xff] }
  0x82   : > { %484 = vmatpush1.bf16.msra.mxu0 %v1206_v13  ;;  %527 = vmatpush1.bf16.msra.mxu1 %v1225_v20 }
  0x83   : > { %485 = vmatprep.subr.bf16.mxu0 %v1733_v14  ;;  %528 = vmatprep.subr.bf16.mxu1 %v1228_v21 }
  0x86   : > { %486 = vmatpush1.bf16.msra.mxu0 %v1212_v18  ;;  %529 = vmatpush1.bf16.msra.mxu1 %v1231_v24 }
  0x87   : > { %487 = vmatprep.subr.bf16.mxu0 %v1214_v19  ;;  %530 = vmatprep.subr.bf16.mxu1 %v1232_v25 }
  0x8a   : > { %488 = vmatpush1.bf16.msra.mxu0 %v1218_v22  ;;  %531 = vmatpush1.bf16.msra.mxu1 %v1234_v28 }
  0x8b   : > { %489 = vmatprep.subr.bf16.mxu0 %v1220_v23  ;;  %532 = vmatprep.subr.bf16.mxu1 %v1235_v29 }
  0x8e   : > { %490 = vmatpush1.bf16.msra.mxu0 %v1224_v26  ;;  %533 = vmatpush1.bf16.msra.mxu1 %v1237_v33 }
  0x8f   : > { %491 = vmatprep.subr.bf16.mxu0 %v1226_v27  ;;  %534 = vmatprep.subr.bf16.mxu1 %v1238_v34 }
  0x92   : > { %492 = vmatpush1.bf16.msra.mxu0 %v1230_v30  ;;  %535 = vmatpush1.bf16.msra.mxu1 %v1240_v36 }
  0x93   : > { %633 = vmatprep.subr.bf16.mxu0 %v1705_v1  ;;  %676 = vmatprep.subr.bf16.mxu1 %v1720_v7 }
  0x95   : > { %510 = vmatmul.mubr.bf16.vlgmr.msra.gmra.mrb[0].mxu0 %v316_v35  ;;  %553 = vmatmul.mubr.bf16.vlgmr.msra.gmra.mrb[0].mxu1 %v316_v35 }
  0x96   : > { %634 = vmatpush1.bf16.msra.mxu0 %v1707_v2  ;;  %665 = vmatprep.mubr.bf16.mxu0 %v1493_v3 }
  0x97   : > { %635 = vmatprep.subr.bf16.mxu0 %v1712_v4  ;;  %677 = vmatpush1.bf16.msra.mxu1 %v1722_v8 }
  0x98   : > { %678 = vmatprep.subr.bf16.mxu1 %v1210_v11  ;;  %708 = vmatprep.mubr.bf16.mxu1 %v1493_v3 }
  0x9a   : > { %636 = vmatpush1.bf16.msra.mxu0 %v1715_v5 }
  0x9b   : > { %637 = vmatprep.subr.bf16.mxu0 %v1718_v6  ;;  %679 = vmatpush1.bf16.msra.mxu1 %v1213_v12 }
  0x9c   : > { %680 = vmatprep.subr.bf16.mxu1 %v1216_v15 }
  0x9e   : > { %638 = vmatpush1.bf16.msra.mxu0 %v1725_v9 }
  0x9f   : > { %639 = vmatprep.subr.bf16.mxu0 %v1729_v10  ;;  %681 = vmatpush1.bf16.msra.mxu1 %v1219_v16 }
  0xa0   : > { %682 = vmatprep.subr.bf16.mxu1 %v1222_v17 }
  0xa2   : > { %640 = vmatpush1.bf16.msra.mxu0 %v1206_v13 }
  0xa3   : > { %641 = vmatprep.subr.bf16.mxu0 %v1733_v14  ;;  %683 = vmatpush1.bf16.msra.mxu1 %v1225_v20 }
  0xa4   : > { %684 = vmatprep.subr.bf16.mxu1 %v1228_v21 }
  0xa6   : > { %642 = vmatpush1.bf16.msra.mxu0 %v1212_v18 }
  0xa7   : > { %643 = vmatprep.subr.bf16.mxu0 %v1214_v19  ;;  %685 = vmatpush1.bf16.msra.mxu1 %v1231_v24  ;;  %v302_v19 = vld [vmem:[#allocation3] sm:$0xff] }
  0xa8   : > { %686 = vmatprep.subr.bf16.mxu1 %v1232_v25 }
  0xaa   : > { %644 = vmatpush1.bf16.msra.mxu0 %v1218_v22  ;;  %v303_v22 = vld [vmem:[#allocation3 + $0x8] sm:$0xff] }
  0xab   : > { %645 = vmatprep.subr.bf16.mxu0 %v1220_v23  ;;  %687 = vmatpush1.bf16.msra.mxu1 %v1234_v28 }
  0xac   : > { %688 = vmatprep.subr.bf16.mxu1 %v1235_v29 }
  0xae   : > { %646 = vmatpush1.bf16.msra.mxu0 %v1224_v26 }
  0xaf   : > { %647 = vmatprep.subr.bf16.mxu0 %v1226_v27  ;;  %689 = vmatpush1.bf16.msra.mxu1 %v1237_v33 }
  0xb0   : > { %690 = vmatprep.subr.bf16.mxu1 %v1238_v34 }
  0xb2   : > { %648 = vmatpush1.bf16.msra.mxu0 %v1230_v30 }
  0xb3   : > { %691 = vmatpush1.bf16.msra.mxu1 %v1240_v36 }
 0x168   : > { %v511_v42 = vpop.f32.mrb[0].mxu0  ;;  %v554_v57 = vpop.f32.mrb[0].mxu1 }
 0x169   : > { %v563_v44 = vadd.f32 %v511_v42, %v308_v39  ;;  %v513_v45 = vpop.f32.mrb[1].mxu0  ;;  %v556_v61 = vpop.f32.mrb[1].mxu1  ;;  %v565_v3 = vadd.f32 %v554_v57, %v310_v60  ;;  %v627_v60 = vunpack.c.h.bf16 %v1046_v49 }
 0x16a   : > { %v564_v47 = vadd.f32 %v513_v45, %v309_v40  ;;  %v515_v48 = vpop.f32.mrb[2].mxu0  ;;  %v558_v63 = vpop.f32.mrb[2].mxu1  ;;  %v566_v0 = vadd.f32 %v556_v61, %v311_v55  ;;  %v1045_v40 = vld [vmem:[%s1694_s27 + $0x20] sm:$0xff] }
 0x16b   : > { %v1039_v50 = vmul.f32 -1.442695, %v563_v44  ;;  %v567_v51 = vadd.f32 %v515_v48, %v312_v41  ;;  %v517_v52 = vpop.f32.mrb[3].mxu0  ;;  %v560_v1 = vpop.f32.mrb[3].mxu1  ;;  %v569_v4 = vadd.f32 %v558_v63, %v314_v62  ;;  %v1047_v41 = vld [vmem:[%s1694_s27 + $0x30] sm:$0xff]  ;;  %v624_v42 = vunpack.c.l.bf16 %v1045_v40  ;;  %v1048_v63 = vld [vmem:[%s1694_s27 + $0x38] sm:$0xff] }
 0x16c   : > { %v1041_v53 = vmul.f32 -1.442695, %v564_v47  ;;  %v568_v54 = vadd.f32 %v517_v52, %v313_v43  ;;  %v570_v2 = vadd.f32 %v560_v1, %v315_v58  ;;  %v1043_v5 = vmul.f32 -1.442695, %v566_v0 }
 0x16d   : > { %1241 = vpow2.f32 %v1039_v50  ;;  %v1040_v56 = vmul.f32 -1.442695, %v567_v51  ;;  %v625_v43 = vunpack.c.h.bf16 %v1045_v40  ;;  %v628_v44 = vunpack.c.l.bf16 %v1047_v41 }
 0x16e   : > { %1243 = vpow2.f32 %v1041_v53  ;;  %v1042_v59 = vmul.f32 -1.442695, %v568_v54  ;;  %v1044_v6 = vmul.f32 -1.442695, %v570_v2  ;;  %v629_v47 = vunpack.c.h.bf16 %v1047_v41  ;;  %v1305_v41 = vld [vmem:[#allocation9] sm:$0xff] (!%p1055_p9)  }
 0x16f   : > { %1245 = vpow2.f32 %v1040_v56  ;;  %v626_v1 = vunpack.c.l.bf16 %v1046_v49 }
 0x170   : > { %1247 = vpow2.f32 %v1042_v59 }
 0x171   : > { %1249 = vtanh.f32 %v565_v3  ;;  %v631_v3 = vunpack.c.h.bf16 %v1048_v63 }
 0x172   : > { %1251 = vtanh.f32 %v569_v4  ;;  %v630_v4 = vunpack.c.l.bf16 %v1048_v63 }
 0x173   : > { %1253 = vpow2.f32 %v1043_v5 }
 0x174   : > { %1255 = vpow2.f32 %v1044_v6 }
 0x177   : > { %v1242_v7 = vpop.eup %1241 }
 0x178   : > { %v1244_v8 = vpop.eup %1243  ;;  %v577_v9 = vadd.f32 1.0, %v1242_v7 }
 0x179   : > { %v1246_v10 = vpop.eup %1245  ;;  %v589_v11 = vadd.f32 1.0, %v1244_v8 }
 0x17a   : > { %v1248_v12 = vpop.eup %1247  ;;  %1257 = vrcp.f32 %v577_v9  ;;  %v578_v13 = vadd.f32 1.0, %v1246_v10 }
 0x17b   : > { %1259 = vrcp.f32 %v589_v11  ;;  %v590_v14 = vadd.f32 1.0, %v1248_v12  ;;  %v1250_v15 = vpop.eup %1249 }
 0x17c   : > { %1261 = vrcp.f32 %v578_v13  ;;  %v1252_v16 = vpop.eup %1251 }
 0x17d   : > { %1263 = vrcp.f32 %v590_v14  ;;  %v1254_v17 = vpop.eup %1253 }
 0x17e   : > { %v1256_v18 = vpop.eup %1255  ;;  %v603_v24 = vadd.f32 1.0, %v1254_v17 }
 0x17f   : > { %v604_v29 = vadd.f32 1.0, %v1256_v18 }
 0x180   : > { %1265 = vrcp.f32 %v603_v24 }
 0x184   : > { %v1258_v20 = vpop.eup %1257 }
 0x185   : > { %v1260_v21 = vpop.eup %1259  ;;  %v611_v23 = vmul.f32 %v1258_v20, %v1250_v15 }
 0x186   : > { %v1262_v25 = vpop.eup %1261  ;;  %v609_v26 = vmul.f32 %v1260_v21, %v302_v19 }
 0x187   : > { %v1264_v27 = vpop.eup %1263  ;;  %v612_v28 = vmul.f32 %v1262_v25, %v1252_v16 }
 0x188   : > { %v610_v30 = vmul.f32 %v1264_v27, %v303_v22  ;;  %v1753_v31 = vadd.f32 %v611_v23, %v609_v26 }
 0x18a   : > { %1267 = vtanh.f32 %v1753_v31  ;;  %v1756_v32 = vadd.f32 %v612_v28, %v610_v30  ;;  %v1266_v33 = vpop.eup %1265 }
 0x18b   : > { %1269 = vrcp.f32 %v604_v29 }
 0x18c   : > { %1271 = vtanh.f32 %v1756_v32 }
 0x194   : > { %v1268_v34 = vpop.eup %1267 }
 0x195   : > { %v1270_v35 = vpop.eup %1269  ;;  %v617_v37 = vmul.f32 %v1268_v34, %v1266_v33 }
 0x196   : > { %v1272_v36 = vpop.eup %1271 }
 0x197   : > { %v618_v38 = vmul.f32 %v1272_v36, %v1270_v35 }
 0x199   : > { %v632_v39 = vpack.c.bf16 %v618_v38, %v617_v37 }
 0x19b   : > { %666 = vmatmul.mubr.bf16.vlgmr.msra.gmra.mrb[4].mxu0 %v632_v39  ;;  %709 = vmatmul.mubr.bf16.vlgmr.msra.gmra.mrb[4].mxu1 %v632_v39 }
 0x26e   : > { %v667_v45 = vpop.f32.mrb[4].mxu0  ;;  %v710_v46 = vpop.f32.mrb[4].mxu1 }
 0x26f   : > { %v719_v48 = vadd.f32 %v667_v45, %v624_v42  ;;  %v669_v50 = vpop.f32.mrb[5].mxu0  ;;  %v712_v51 = vpop.f32.mrb[5].mxu1  ;;  %v721_v5 = vadd.f32 %v710_v46, %v626_v1  ;;  %v1494_v42 = vmov (!%p1055_p9), 0.0   ;;  %v1309_v45 = vld [vmem:[#allocation9 + $0x20] sm:$0xff] (!%p1055_p9)   ;;  %v1310_v46 = vld [vmem:[#allocation9 + $0x28] sm:$0xff] (!%p1055_p9)  }
 0x270   : > { %v720_v52 = vadd.f32 %v669_v50, %v625_v43  ;;  %v671_v53 = vpop.f32.mrb[6].mxu0  ;;  %v714_v54 = vpop.f32.mrb[6].mxu1  ;;  %v722_v2 = vadd.f32 %v712_v51, %v627_v60  ;;  %1080 = vmatprep.subr.bf16.mxu0 (!%p1055_p9), %v1494_v42  ;;  %1096 = vmatprep.mubr.msk.bf16.mxu0 (!%p1055_p9), %vm1495_vm0, %v1494_v42  ;;  %v1307_v43 = vld [vmem:[#allocation9 + $0x10] sm:$0xff] (!%p1055_p9)   ;;  %v1056_v50 = vld [vmem:[%s1818_s3] ss:$0 sm:$0xff] (!%p1055_p9) }
 0x271   : > { %v1049_v55 = vmul.f32 -1.442695, %v719_v48  ;;  %v723_v56 = vadd.f32 %v671_v53, %v628_v44  ;;  %v673_v57 = vpop.f32.mrb[7].mxu0  ;;  %v716_v58 = vpop.f32.mrb[7].mxu1  ;;  %v725_v8 = vadd.f32 %v714_v54, %v630_v4  ;;  %1081 = vmatpush3.bf16.msra.mxu0 (!%p1055_p9), %v1305_v41  ;;  %v1308_v44 = vld [vmem:[#allocation9 + $0x18] sm:$0xff] (!%p1055_p9)  }
 0x272   : > { %v1051_v59 = vmul.f32 -1.442695, %v720_v52  ;;  %v724_v61 = vadd.f32 %v673_v57, %v629_v47  ;;  %v1053_v6 = vmul.f32 -1.442695, %v722_v2  ;;  %v726_v7 = vadd.f32 %v716_v58, %v631_v3  ;;  %1082 = vmatprep.subr.bf16.mxu0 (!%p1055_p9), %v1494_v42  ;;  %v1311_v47 = vld [vmem:[#allocation9 + $0x30] sm:$0xff] (!%p1055_p9)   ;;  %v1312_v48 = vld [vmem:[#allocation9 + $0x38] sm:$0xff] (!%p1055_p9)  }
 0x273   : > { %1273 = vpow2.f32 %v1049_v55  ;;  %v1050_v62 = vmul.f32 -1.442695, %v723_v56 }
 0x274   : > { %1275 = vpow2.f32 %v1051_v59  ;;  %v1052_v0 = vmul.f32 -1.442695, %v724_v61  ;;  %v1054_v12 = vmul.f32 -1.442695, %v726_v7 }
 0x275   : > { %1277 = vpow2.f32 %v1050_v62 }
 0x276   : > { %1279 = vpow2.f32 %v1052_v0 }
 0x277   : > { %1281 = vtanh.f32 %v721_v5 }
 0x278   : > { %1283 = vpow2.f32 %v1053_v6 }
 0x279   : > { %1285 = vtanh.f32 %v725_v8 }
 0x27d   : > { %v1274_v9 = vpop.eup %1273 }
 0x27e   : > { %v1276_v10 = vpop.eup %1275  ;;  %v733_v11 = vadd.f32 1.0, %v1274_v9 }
 0x27f   : > { %v745_v13 = vadd.f32 1.0, %v1276_v10  ;;  %v1278_v14 = vpop.eup %1277 }
 0x280   : > { %1287 = vrcp.f32 %v733_v11  ;;  %v734_v15 = vadd.f32 1.0, %v1278_v14  ;;  %v1280_v16 = vpop.eup %1279 }
 0x281   : > { %1289 = vrcp.f32 %v745_v13  ;;  %v746_v17 = vadd.f32 1.0, %v1280_v16  ;;  %v1282_v18 = vpop.eup %1281 }
 0x282   : > { %1291 = vpow2.f32 %v1054_v12  ;;  %v1284_v19 = vpop.eup %1283 }
 0x283   : > { %1293 = vrcp.f32 %v734_v15  ;;  %v1286_v20 = vpop.eup %1285  ;;  %v759_v24 = vadd.f32 1.0, %v1284_v19 }
 0x284   : > { %1295 = vrcp.f32 %v746_v17 }
 0x285   : > { %1297 = vrcp.f32 %v759_v24 }
 0x28a   : > { %v1288_v21 = vpop.eup %1287 }
 0x28b   : > { %v1290_v22 = vpop.eup %1289  ;;  %v767_v23 = vmul.f32 %v1288_v21, %v1282_v18 }
 0x28c   : > { %v1292_v25 = vpop.eup %1291  ;;  %v765_v26 = vmul.f32 %v1290_v22, %v1753_v31 }
 0x28d   : > { %v1294_v27 = vpop.eup %1293  ;;  %v760_v33 = vadd.f32 1.0, %v1292_v25 }
 0x28e   : > { %v769_v28 = vadd.f32 %v767_v23, %v765_v26  ;;  %v768_v29 = vmul.f32 %v1294_v27, %v1286_v20  ;;  %v1296_v30 = vpop.eup %1295 }
 0x28f   : > { %v766_v34 = vmul.f32 %v1296_v30, %v1756_v32  ;;  %v1298_v36 = vpop.eup %1297  ;;  %v1306_v32 = vld [vmem:[#allocation9 + $0x8] sm:$0xff] (!%p1055_p9)  }
 0x290   : > { %1299 = vtanh.f32 %v769_v28  ;;  %777 = vst [vmem:[#allocation3] sm:$0xff] %v769_v28  ;;  %1083 = vmatpush3.bf16.msra.mxu0 (!%p1055_p9), %v1306_v32 }
 0x291   : > { %v770_v35 = vadd.f32 %v768_v29, %v766_v34  ;;  %1301 = vrcp.f32 %v760_v33  ;;  %1084 = vmatprep.subr.bf16.mxu0 (!%p1055_p9), %v1494_v42 }
 0x293   : > { %1303 = vtanh.f32 %v770_v35  ;;  %778 = vst [vmem:[#allocation3 + $0x8] sm:$0xff] %v770_v35 }
 0x294   : > { %1085 = vmatpush3.bf16.msra.mxu0 (!%p1055_p9), %v1307_v43 }
 0x295   : > { %1086 = vmatprep.subr.bf16.mxu0 (!%p1055_p9), %v1494_v42 }
 0x298   : > { %1087 = vmatpush3.bf16.msra.mxu0 (!%p1055_p9), %v1308_v44 }
 0x299   : > { %1088 = vmatprep.subr.bf16.mxu0 (!%p1055_p9), %v1494_v42 }
 0x29a   : > { %v1300_v37 = vpop.eup %1299  ;;  %782 = sbr.rel (%p1055_p9) target bundleno = 900 (0x384), region = 56 }
 0x29b   : > { %v773_v38 = vmul.f32 %v1300_v37, %v1298_v36  ;;  %v1302_v39 = vpop.eup %1301 }
 0x29c   : > { %1089 = vmatpush3.bf16.msra.mxu0 (!%p1055_p9), %v1309_v45 }
 0x29d   : > { %775 = vst [vmem:[#allocation2] sm:$0xff] %v773_v38  ;;  %v1304_v31 = vpop.eup %1303  ;;  %1090 = vmatprep.subr.bf16.mxu0 (!%p1055_p9), %v1494_v42 }
 0x29e   : > { %v774_v40 = vmul.f32 %v1304_v31, %v1302_v39 }
 0x2a0   : > { %776 = vst [vmem:[#allocation2 + $0x8] sm:$0xff] %v774_v40  ;;  %1091 = vmatpush3.bf16.msra.mxu0 (!%p1055_p9), %v1310_v46  ;;  %v783_v49 = vpack.c.bf16 (!%p1055_p9), %v774_v40, %v773_v38 }
 0x2a1   : > { %1092 = vmatprep.subr.bf16.mxu0 %v1494_v42 }
 0x2a4   : > { %1093 = vmatpush3.bf16.msra.mxu0 %v1311_v47 }
 0x2a5   : > { %1094 = vmatprep.subr.bf16.mxu0 %v1494_v42 }
 0x2a8   : > { %1095 = vmatpush3.bf16.msra.mxu0 %v1312_v48 }
 0x2ab   : > { %1097 = vmatmul.mubr.bf16.vlgmr.msra.gmra.mrb[0].mxu0 %v783_v49 }
 0x37e   : > { %v889_v51 = vpop.f32.mrb[0].mxu0 }
 0x37f   : > { %v890_v52 = vadd.f32 %v1056_v50, %v889_v51  ;;  %v1098_v53 = vpop.f32.mrb[1].mxu0 }
 0x380   : > { %v892_v54 = vpop.f32.mrb[2].mxu0 }
 0x381   : > { %896 = vst [vmem:[#allocation10] sm:$0xff] %v890_v52  ;;  %v893_v55 = vadd.f32 %v1056_v50, %v892_v54  ;;  %v1099_v56 = vpop.f32.mrb[3].mxu0 }
 0x383   : > { %897 = vst [vmem:[#allocation10 + $0x8] sm:$0xff] %v893_v55 }
 0x384 PF: > { %p1771_p1 = scmp.eq.s32.totalorder %s993_s21, 3  ;;  %s1496_s24 = smov [#allocation10]  }
 0x385   : > { %s907_s12 = sshll.u32 %s1496_s24, 4  ;;  %s908_s12 = int_to_ptr.vmem [resolvable:$true] %s907_s12 }
 0x386   : > { %s1399_s13 = scalar_lea.vmem %s908_s12, 256  ;;  %p1406_p10 = scmp.lt.s32.totalorder %s908_s12, %s908_s12 }
 0x387   : > { %p1400_p4 = scmp.ne.s32.totalorder %s908_s12, %s1399_s13  ;;  %p1407_p11 = scmp.lt.s32.totalorder %s1399_s13, %s1399_s13 }
 0x389   : > { %p1401_p5 = pnand %p1400_p4, %p1771_p1  ;;  %p1408_p13 = por %p1407_p11, %p1406_p10 }
 0x38b   : > { %p1402_p8 = pneg %p1401_p5 }
 0x38d   : > { %p1409_p2 = pnand %p1408_p13, %p1402_p8 }
 0x38f   : > { %1412 = shalt.err (!%p1409_p2)
}
 0x390   : > { %s1413_s21 = scalar_lea.hbm %s1819_s4, 256 }
 0x391   : > { %p1414_p3 = scmp.ne.s32.totalorder %s1819_s4, %s1413_s21  ;;  %p1419_p6 = scmp.lt.u32.totalorder %s1413_s21, %s1819_s4 }
 0x393   : > { %p1415_p12 = pnand %p1414_p3, %p1771_p1 }
 0x395   : > { %p1416_p0 = pneg %p1415_p12 }
 0x397   : > { %p1421_p7 = pnand %p1419_p6, %p1416_p0 }
 0x399   : > { %1424 = shalt.err (!%p1421_p7)
}
 0x39a   : > { %s1497_s29 = smov 128   ;;  %s1498_s26 = smov 8  }
 0x39b   : > { %1111 = dma.vmem_to_hbm [thread:$0]  (%p1771_p1), %s908_s12, 256, %s1819_s4, [#allocation6], %s1497_s29, %s1497_s29, %s1498_s26  }
 0x39c   : > { %1458 = dma.done.wait (%p1771_p1), [#allocation6], 256  }
 0x39d   : > { %1460 = vsyncadd (%p1771_p1), [#allocation6], 4294967040 }
 0x39e PF: > { %s19_s20 = sadd.s32 1, %s1483_s20   ;;  %s1833_s30 = smov %s1840_s15 }
 0x39f   : > { %p16_p9 = scmp.ge.s32.totalorder %s19_s20, 6   ;;  %s1834_s15 = smov %s1467_s16 }
 0x3a0   : > { %s1835_s16 = smov %s1471_s17  ;;  %s1836_s17 = smov %s1645_s6 }
 0x3a1   : > { %s1837_s18 = smov %s1479_s19  ;;  %s1838_s19 = smov %s1833_s30 }
 0x3a2   :  { %18 = sbr.rel (!%p16_p9) target bundleno = 6 (0x6), region = 91 }
 0x3a9   :  { %923 = vsyncpa [#allocation5], 1 }
 0x3aa   :  { %925 = vsyncpa [#allocation5 + $0x1], 1 }
 0x3ab   :  { %926 = vsyncpa [#allocation8], 1 }
 0x3ac   :  { %927 = vsyncpa [#allocation6], 1 }
 0x3ad   :  { %929 = vsyncpa [#allocation6 + $0x1], 1 }

</bundles_post_ra>
